<compile_context>
chip_gen: v5e
topology: v5e:2x2
jax: 0.10.0
libtpu: 0.0.40
codegen_flags: <defaults>
</compile_context>

<pallas_src>
import functools

import jax
import jax.numpy as jnp
from jax.experimental import pallas as pl
from jax.experimental.pallas import tpu as pltpu

_SUBLANE = 8
_LANE = 128
_NEG = -1e30  # padding value for padded logit columns (exp underflows to 0)


def _round_up(x, m):
    return ((x + m - 1) // m) * m


def _vmem_budget_bytes():
    """Generation-aware VMEM budget: ~3/4 of physical VMEM
    (~96 MiB on v5e/v6e's 128 MiB, ~48 MiB on v7x's 64 MiB)."""
    cap = 64 * 1024 * 1024
    try:
        cap = int(pltpu.get_tpu_info().vmem_capacity_bytes)
    except Exception:
        pass
    return int(min(cap * 3 // 4, 100 * 1024 * 1024))


def _pick_tile_n(n, v_rows, v_cols, budget_bytes, with_logits):
    """Largest row tile whose per-step VMEM footprint fits the budget."""
    def est(t):
        table = 2 * v_rows * v_cols * 4        # table block (double-buffered by default)
        idx_tgt = 2 * 2 * t * 4                # idx + tgt blocks, double-buffered
        logits_io = (2 * t * v_cols * 4) if with_logits else 0  # logits output, dbl-buf
        tmp = t * (v_rows + 2 * v_cols) * 4    # one-hot + logits/CE temporaries
        return table + idx_tgt + logits_io + tmp

    tile = _SUBLANE
    for cand in (8192, 4096, 2048, 1024, 512, 256, 128, 64, 32, 16, 8):
        if est(cand) <= budget_bytes:
            tile = cand
            break
    return max(_SUBLANE, min(tile, _round_up(n, _SUBLANE)))


# ---------------------------------------------------------------------------
# In-kernel helpers
# ---------------------------------------------------------------------------

def _compute_logits_f32(idx_ref, table_ref, tile_n):
    """Embedding lookup as one_hot(idx) @ table on the MXU (f32)."""
    v_rows = table_ref.shape[0]
    row_ids = jax.lax.broadcasted_iota(jnp.int32, (tile_n, v_rows), 1)
    onehot = (row_ids == idx_ref[...]).astype(jnp.float32)          # (tile_n, Vr)
    return jnp.dot(onehot, table_ref[...],
                   preferred_element_type=jnp.float32)              # (tile_n, Vc)


def _tile_loss_sum(logits, tgt_ref, tile_base, n_valid):
    """Sum of per-row cross-entropy for this tile (raw sum, no mean)."""
    tile_n, v_cols = logits.shape
    col = jax.lax.broadcasted_iota(jnp.int32, (tile_n, v_cols), 1)
    m = jnp.max(logits, axis=-1, keepdims=True)                     # (tile_n, 1)
    lse = m + jnp.log(jnp.sum(jnp.exp(logits - m), axis=-1, keepdims=True))
    picked = jnp.sum(jnp.where(col == tgt_ref[...], logits, 0.0),
                     axis=-1, keepdims=True)                        # (tile_n, 1)
    per_row = lse - picked
    # mask rows that are pure padding (global row >= true N)
    glob_row = jax.lax.broadcasted_iota(jnp.int32, (tile_n, 1), 0) + tile_base
    per_row = jnp.where(glob_row < n_valid, per_row, 0.0)
    return jnp.sum(per_row)


# ---------------------------------------------------------------------------
# Kernels
# ---------------------------------------------------------------------------

def _bigram_logits_kernel(idx_ref, table_ref, logits_ref):
    """Inference path: embedding lookup only."""
    tile_n = logits_ref.shape[0]
    logits = _compute_logits_f32(idx_ref, table_ref, tile_n)
    logits_ref[...] = logits.astype(logits_ref.dtype)


def _bigram_logits_loss_kernel(idx_ref, tgt_ref, table_ref,
                               logits_ref, loss_ref, *, n_valid):
    """Training path: lookup + fused cross-entropy, logits written back.

    Each grid step writes its own (1,1) SMEM partial-loss block, so the row
    axis can be "parallel" (v7x megacore) with no cross-step dependency.
    """
    i = pl.program_id(0)
    tile_n = logits_ref.shape[0]
    logits = _compute_logits_f32(idx_ref, table_ref, tile_n)
    logits_ref[...] = logits.astype(logits_ref.dtype)
    loss_ref[0, 0] = _tile_loss_sum(logits, tgt_ref, i * tile_n, n_valid)


def _bigram_loss_only_kernel(idx_ref, tgt_ref, table_ref, loss_ref,
                             *, n_valid, tile_n):
    """Training path, loss only: no logits HBM writeback at all."""
    i = pl.program_id(0)
    logits = _compute_logits_f32(idx_ref, table_ref, tile_n)
    loss_ref[0, 0] = _tile_loss_sum(logits, tgt_ref, i * tile_n, n_valid)


# ---------------------------------------------------------------------------
# Wrapper (== BigramLanguageModel.forward)
# ---------------------------------------------------------------------------

def bigram_forward(idx, table, targets=None, *, return_logits=True,
                   logits_dtype=jnp.float32):
    """Equivalent of BigramLanguageModel.forward.

    idx: (B, T) int token ids
    table: (V, V) float embedding weight (nn.Embedding)
    targets: optional (B, T) int

    Returns (logits, loss):
      - targets is None                      -> logits (B, T, V), loss None
      - targets given, return_logits=True    -> logits (B*T, V),  scalar loss
      - targets given, return_logits=False   -> None,             scalar loss
    """
    B, T = idx.shape
    V = table.shape[0]
    N = B * T

    v_cols = _round_up(max(V, _LANE), _LANE)   # lane-dense logit axis (>= 128)
    v_rows = _round_up(max(V, _LANE), _LANE)   # lane-aligned contraction axis

    table_p = jnp.pad(table.astype(jnp.float32),
                      ((0, v_rows - V), (0, v_cols - V)))
    if v_cols > V:
        # padded logit columns become very negative so softmax/CE ignore them
        col_valid = jnp.arange(v_cols) < V
        table_p = jnp.where(col_valid[None, :], table_p, _NEG)

    with_logits = (targets is None) or return_logits
    budget = _vmem_budget_bytes()
    tile_n = _pick_tile_n(N, v_rows, v_cols, budget, with_logits)
    n_pad = _round_up(N, tile_n)
    grid = (n_pad // tile_n,)
    n_tiles = grid[0]

    idx_flat = jnp.pad(idx.reshape(-1).astype(jnp.int32), (0, n_pad - N))
    idx_flat = idx_flat.reshape(n_pad, 1)

    idx_spec = pl.BlockSpec((tile_n, 1), lambda i: (i, 0))
    tgt_spec = pl.BlockSpec((tile_n, 1), lambda i: (i, 0))
    tab_spec = pl.BlockSpec((v_rows, v_cols), lambda i: (0, 0))
    logit_spec = pl.BlockSpec((tile_n, v_cols), lambda i: (i, 0))
    loss_spec = pl.BlockSpec((1, 1), lambda i: (i, 0),
                             memory_space=pltpu.MemorySpace.SMEM)
    logits_shape = jax.ShapeDtypeStruct((n_pad, v_cols), logits_dtype)
    loss_shape = jax.ShapeDtypeStruct((n_tiles, 1), jnp.float32)

    compiler_params = pltpu.CompilerParams(
        dimension_semantics=("parallel",),
        vmem_limit_bytes=int(budget),
    )

    def _unpad_logits(lp):
        if n_pad == N and v_cols == V:
            return lp          # no post-kernel un-pad copy needed
        return lp[:N, :V]

    if targets is None:
        # Inference path: pure lookup, no cross-entropy work, no dummy inputs.
        logits_p = pl.pallas_call(
            _bigram_logits_kernel,
            out_shape=logits_shape,
            grid=grid,
            in_specs=[idx_spec, tab_spec],
            out_specs=logit_spec,
            compiler_params=compiler_params,
        )(idx_flat, table_p)
        return _unpad_logits(logits_p).reshape(B, T, V), None

    tgt_flat = jnp.pad(targets.reshape(-1).astype(jnp.int32), (0, n_pad - N))
    tgt_flat = tgt_flat.reshape(n_pad, 1)

    if return_logits:
        kernel = functools.partial(_bigram_logits_loss_kernel, n_valid=N)
        logits_p, loss_parts = pl.pallas_call(
            kernel,
            out_shape=(logits_shape, loss_shape),
            grid=grid,
            in_specs=[idx_spec, tgt_spec, tab_spec],
            out_specs=(logit_spec, loss_spec),
            compiler_params=compiler_params,
        )(idx_flat, tgt_flat, table_p)
        loss = jnp.sum(loss_parts) / jnp.float32(N)
        return _unpad_logits(logits_p), loss

    # Loss-only variant: skips the (n_pad, v_cols) logits writeback entirely.
    kernel = functools.partial(_bigram_loss_only_kernel, n_valid=N, tile_n=tile_n)
    loss_parts = pl.pallas_call(
        kernel,
        out_shape=loss_shape,
        grid=grid,
        in_specs=[idx_spec, tgt_spec, tab_spec],
        out_specs=loss_spec,
        compiler_params=compiler_params,
    )(idx_flat, tgt_flat, table_p)
    loss = jnp.sum(loss_parts) / jnp.float32(N)
    return None, loss


# ---------------------------------------------------------------------------
# Pure-JAX reference + self-test
# ---------------------------------------------------------------------------

def _reference_forward(idx, table, targets):
    logits = table[idx]                              # (B, T, V)
    B, T, V = logits.shape
    lg = logits.reshape(B * T, V)
    tg = targets.reshape(B * T)
    lse = jax.scipy.special.logsumexp(lg, axis=-1)
    picked = jnp.take_along_axis(lg, tg[:, None], axis=-1)[:, 0]
    return lg, jnp.mean(lse - picked)


if __name__ == "__main__":
    vocab_size = 64          # V (small synthetic vocab)
    B, T = 4, 8              # as in the module docstring

    key = jax.random.PRNGKey(0)
    k_tab, k_idx, k_tgt = jax.random.split(key, 3)

    # nn.Embedding default init: N(0, 1)
    table = jax.random.normal(k_tab, (vocab_size, vocab_size), dtype=jnp.float32)
    idx = jax.random.randint(k_idx, (B, T), 0, vocab_size, dtype=jnp.int32)
    targets = jax.random.randint(k_tgt, (B, T), 0, vocab_size, dtype=jnp.int32)

    # with targets: logits (B*T, V), scalar loss
    logits, loss = bigram_forward(idx, table, targets)
    logits = jax.block_until_ready(logits)
    loss = jax.block_until_ready(loss)

    # with targets, loss-only fast path (no logits writeback)
    _, loss_only = bigram_forward(idx, table, targets, return_logits=False)
    loss_only = jax.block_until_ready(loss_only)

    # without targets: logits (B, T, V), loss None
    logits_nt, loss_nt = bigram_forward(idx, table, None)
    logits_nt = jax.block_until_ready(logits_nt)

    # verify against pure-JAX reference
    ref_logits, ref_loss = _reference_forward(idx, table, targets)
    assert logits.shape == (B * T, vocab_size)
    assert logits_nt.shape == (B, T, vocab_size)
    assert loss_nt is None
    assert jnp.allclose(logits, ref_logits, atol=1e-5, rtol=1e-5)
    assert jnp.allclose(logits_nt.reshape(B * T, vocab_size), ref_logits,
                        atol=1e-5, rtol=1e-5)
    assert jnp.allclose(loss, ref_loss, atol=1e-5, rtol=1e-5)
    assert jnp.allclose(loss_only, ref_loss, atol=1e-5, rtol=1e-5)

    print("KERNEL_OK")
</pallas_src>

<mosaic_0001>
module attributes {stable_mosaic.version = 11 : i64} {
  func.func @_bigram_logits_loss_kernel(%arg0: i32, %arg1: memref<32x1xi32, #tpu.memory_space<vmem>>, %arg2: memref<32x1xi32, #tpu.memory_space<vmem>>, %arg3: memref<128x128xf32, #tpu.memory_space<vmem>>, %arg4: memref<32x128xf32, #tpu.memory_space<vmem>>, %arg5: memref<1x1xf32, #tpu.memory_space<smem>>) attributes {dimension_semantics = [#tpu.dimension_semantics<parallel>], iteration_bounds = array<i64: 1>, scalar_prefetch = 0 : i64, scratch_operands = 0 : i64, tpu.core_type = #tpu.core_type<tc>, window_params = [{transform_indices = @transform_0, window_bounds = array<i64: 32, 1>}, {transform_indices = @transform_1, window_bounds = array<i64: 32, 1>}, {pipeline_mode = #tpu.pipeline_mode<synchronous>, transform_indices = @transform_2, window_bounds = array<i64: 128, 128>}, {transform_indices = @transform_3, window_bounds = array<i64: 32, 128>}, {transform_indices = @transform_4, window_bounds = array<i64: 1, 1>}]} {
    %0 = tpu.iota {dimensions = array<i32: 1>} : vector<32x128xi32>
    %c0 = arith.constant 0 : index
    %c0_0 = arith.constant 0 : index
    %1 = vector.load %arg1[%c0, %c0_0] : memref<32x1xi32, #tpu.memory_space<vmem>>, vector<32x1xi32>
    %2 = vector.broadcast %1 : vector<32x1xi32> to vector<32x128xi32>
    %3 = arith.cmpi eq, %0, %2 : vector<32x128xi32>
    %4 = arith.extui %3 : vector<32x128xi1> to vector<32x128xi32>
    %5 = arith.sitofp %4 : vector<32x128xi32> to vector<32x128xf32>
    %c0_1 = arith.constant 0 : index
    %c0_2 = arith.constant 0 : index
    %6 = vector.load %arg3[%c0_1, %c0_2] : memref<128x128xf32, #tpu.memory_space<vmem>>, vector<128x128xf32>
    %cst = arith.constant dense<0.000000e+00> : vector<32x128xf32>
    %7 = tpu.matmul %5, %6, %cst {dimension_numbers = #tpu.dot_dimension_numbers<[1], [0], [0], [1], [0, 0, 1, 1], [], []>} : vector<32x128xf32>, vector<128x128xf32>, vector<32x128xf32> -> vector<32x128xf32>
    %c0_3 = arith.constant 0 : index
    %c0_4 = arith.constant 0 : index
    %8 = vector.load %arg4[%c0_3, %c0_4] : memref<32x128xf32, #tpu.memory_space<vmem>>, vector<32x128xf32>
    tpu.vector_store %arg4[%c0_3, %c0_4], %7 {strides = array<i32>} : memref<32x128xf32, #tpu.memory_space<vmem>>, vector<32x128xf32>,
    %c32_i32 = arith.constant 32 : i32
    %9 = arith.muli %arg0, %c32_i32 : i32
    %10 = tpu.iota {dimensions = array<i32: 1>} : vector<32x128xi32>
    %cst_5 = arith.constant dense<0xFF800000> : vector<32xf32>
    %11 = vector.multi_reduction <maximumf>, %7, %cst_5 [1] : vector<32x128xf32> to vector<32xf32>
    %12 = vector.shape_cast %11 : vector<32xf32> to vector<32x1xf32>
    %13 = vector.broadcast %12 : vector<32x1xf32> to vector<32x128xf32>
    %14 = arith.subf %7, %13 : vector<32x128xf32>
    %15 = math.exp %14 : vector<32x128xf32>
    %cst_6 = arith.constant dense<0.000000e+00> : vector<32xf32>
    %16 = vector.multi_reduction <add>, %15, %cst_6 [1] : vector<32x128xf32> to vector<32xf32>
    %17 = vector.shape_cast %16 : vector<32xf32> to vector<32x1xf32>
    %18 = math.log %17 : vector<32x1xf32>
    %19 = arith.addf %12, %18 : vector<32x1xf32>
    %c0_7 = arith.constant 0 : index
    %c0_8 = arith.constant 0 : index
    %20 = vector.load %arg2[%c0_7, %c0_8] : memref<32x1xi32, #tpu.memory_space<vmem>>, vector<32x1xi32>
    %21 = vector.broadcast %20 : vector<32x1xi32> to vector<32x128xi32>
    %22 = arith.cmpi eq, %10, %21 : vector<32x128xi32>
    %cst_9 = arith.constant 0.000000e+00 : f32
    %23 = vector.broadcast %cst_9 : f32 to vector<32x128xf32>
    %24 = arith.select %22, %7, %23 : vector<32x128xi1>, vector<32x128xf32>
    %cst_10 = arith.constant dense<0.000000e+00> : vector<32xf32>
    %25 = vector.multi_reduction <add>, %24, %cst_10 [1] : vector<32x128xf32> to vector<32xf32>
    %26 = vector.shape_cast %25 : vector<32xf32> to vector<32x1xf32>
    %27 = arith.subf %19, %26 : vector<32x1xf32>
    %28 = tpu.iota {dimensions = array<i32: 0>} : vector<32x1xi32>
    %29 = vector.broadcast %9 : i32 to vector<32x1xi32>
    %30 = arith.addi %28, %29 : vector<32x1xi32>
    %c32_i32_11 = arith.constant 32 : i32
    %31 = vector.broadcast %c32_i32_11 : i32 to vector<32x1xi32>
    %32 = arith.cmpi slt, %30, %31 : vector<32x1xi32>
    %cst_12 = arith.constant 0.000000e+00 : f32
    %33 = vector.broadcast %cst_12 : f32 to vector<32x1xf32>
    %34 = arith.select %32, %27, %33 : vector<32x1xi1>, vector<32x1xf32>
    %35 = vector.shape_cast %34 : vector<32x1xf32> to vector<1x32x1xf32>
    %cst_13 = arith.constant dense<0.000000e+00> : vector<1xf32>
    %36 = vector.multi_reduction <add>, %35, %cst_13 [1, 2] : vector<1x32x1xf32> to vector<1xf32>
    %37 = vector.shape_cast %36 : vector<1xf32> to vector<1x1x1xf32>
    %38 = vector.extract %37[0, 0, 0] : f32 from vector<1x1x1xf32>
    %c0_14 = arith.constant 0 : index
    %c0_15 = arith.constant 0 : index
    %39 = memref.load %arg5[%c0_14, %c0_15] : memref<1x1xf32, #tpu.memory_space<smem>>
    memref.store %38, %arg5[%c0_14, %c0_15] : memref<1x1xf32, #tpu.memory_space<smem>>
    return
  }
  func.func @transform_0(%arg0: i32) -> (i32, i32) {
    %c0_i32 = arith.constant 0 : i32
    %c0_i32_0 = arith.constant 0 : i32
    return %arg0, %c0_i32 : i32, i32
  }
  func.func @transform_1(%arg0: i32) -> (i32, i32) {
    %c0_i32 = arith.constant 0 : i32
    %c0_i32_0 = arith.constant 0 : i32
    return %arg0, %c0_i32 : i32, i32
  }
  func.func @transform_2(%arg0: i32) -> (i32, i32) {
    %c0_i32 = arith.constant 0 : i32
    %c0_i32_0 = arith.constant 0 : i32
    %c0_i32_1 = arith.constant 0 : i32
    return %c0_i32, %c0_i32_0 : i32, i32
  }
  func.func @transform_3(%arg0: i32) -> (i32, i32) {
    %c0_i32 = arith.constant 0 : i32
    %c0_i32_0 = arith.constant 0 : i32
    return %arg0, %c0_i32 : i32, i32
  }
  func.func @transform_4(%arg0: i32) -> (i32, i32) {
    %c0_i32 = arith.constant 0 : i32
    %c0_i32_0 = arith.constant 0 : i32
    return %arg0, %c0_i32 : i32, i32
  }
}

</mosaic_0001>

<bundles_post_ra>
// kernel: tpu_custom_call.1
= control target key start
LH: loop header
LB: loop body
LE: loop exit
PB: predicated region body
PF: predicated region fallthrough
CT: control target
= control target key end

     0   :  { %10 = vsyncpa [#allocation3], 0  ;;  %s492_s0 = inlined_call_operand.vmem [shape: s32[32,1], index: 0, kind: input, shape index: {}]   ;;  %s493_s1 = inlined_call_operand.vmem [shape: s32[32,1], index: 1, kind: input, shape index: {}]   ;;  %s494_s2 = inlined_call_operand.hbm [shape: f32[128,128], index: 2, kind: input, shape index: {}]   ;;  %s495_s3 = inlined_call_operand.hbm [shape: f32[32,128], index: 3, kind: output, shape index: {0}]   ;;  %s496_s4 = inlined_call_operand.hbm [shape: f32[1,1], index: 4, kind: output, shape index: {1}]  }
   0x1   :  { %11 = vsyncpa [#allocation4], 0 }
   0x2   :  { %12 = vsyncpa [#allocation5], 0  ;;  %s21_s17 = sshll.u32 %s494_s2, 4  ;;  %s411_s18 = smov [#allocation2]   ;;  %s22_s17 = int_to_ptr.hbm [resolvable:$true] %s21_s17 }
   0x3   :  { %s23_s19 = sshll.u32 %s411_s18, 4  ;;  %s412_s20 = smov 128   ;;  %s24_s19 = int_to_ptr.vmem [resolvable:$true] %s23_s19 }
   0x4   :  { %s413_s21 = smov 8  }
   0x5   :  { %29 = dma.hbm_to_vmem [thread:$0]  %s22_s17, 2048, %s24_s19, [#allocation3], %s412_s20, %s412_s20, %s413_s21  }
   0x6   :  { %405 = dma.done.wait [#allocation3], 2048  }
   0x7   :  { %406 = vsyncadd [#allocation3], 4294965248  ;;  %v414_v0 = vmov 0   ;;  %v38_v1 = vld [vmem:[%s492_s0 + $0x10] sm:$0xff]  ;;  %v36_v2 = vld [vmem:[%s492_s0] sm:$0xff]  ;;  %v34_v21 = vlaneseq  ;;  %v415_v25 = vmov 1.0  }
   0x8   :  { %327 = vset.pattern.permute.xlu1 %v414_v0  ;;  %326 = vset.pattern.permute.xlu0 %v414_v0  ;;  %v79_v3 = vld [vmem:[#allocation2 + $0x78] sm:$0xff]  ;;  %v78_v4 = vld [vmem:[#allocation2 + $0x70] sm:$0xff]  ;;  %v77_v5 = vld [vmem:[#allocation2 + $0x68] sm:$0xff]  ;;  %vm208_vm8 = vcmask 7168   ;;  %s233_s13 = sshll.u32 %s495_s3, 4  ;;  %s245_s16 = sshll.u32 %s496_s4, 4  ;;  %s234_s13 = int_to_ptr.hbm [resolvable:$true] %s233_s13  ;;  %s246_s16 = int_to_ptr.hbm [resolvable:$true] %s245_s16 }
   0x9   :  { %328 = vset.pattern.permute.xlu2 %v414_v0  ;;  %47 = vperm.xlu0 %326, %v38_v1   ;;  %v76_v6 = vld [vmem:[#allocation2 + $0x60] sm:$0xff]  ;;  %v39_v7 = vld [vmem:[%s492_s0 + $0x18] sm:$0xff]  ;;  %v37_v8 = vld [vmem:[%s492_s0 + $0x8] sm:$0xff]  ;;  %v461_v22 = vand.u32 127, %v34_v21  ;;  %s417_s17 = smov [#allocation7]  }
   0xa   :  { %41 = vperm.xlu1 %327, %v36_v2   ;;  %80 = vmatpush.msra.mxu0 %v79_v3  ;;  %v75_v9 = vld [vmem:[#allocation2 + $0x58] sm:$0xff]  ;;  %v74_v10 = vld [vmem:[#allocation2 + $0x50] sm:$0xff]  ;;  %v73_v11 = vld [vmem:[#allocation2 + $0x48] sm:$0xff] }
   0xb   :  { %270 = vmatpush.msra.mxu2 %v79_v3  ;;  %269 = vmatpush.msra.mxu1 %v79_v3  ;;  %v72_v12 = vld [vmem:[#allocation2 + $0x40] sm:$0xff]  ;;  %v71_v13 = vld [vmem:[#allocation2 + $0x38] sm:$0xff]  ;;  %v70_v14 = vld [vmem:[#allocation2 + $0x30] sm:$0xff] }
   0xc   :  { %271 = vmatpush.msra.mxu3 %v79_v3  ;;  %81 = vmatpush.msra.mxu0 %v78_v4  ;;  %v69_v15 = vld [vmem:[#allocation2 + $0x28] sm:$0xff]  ;;  %v68_v16 = vld [vmem:[#allocation2 + $0x20] sm:$0xff]  ;;  %v67_v17 = vld [vmem:[#allocation2 + $0x18] sm:$0xff] }
   0xd   :  { %273 = vmatpush.msra.mxu2 %v78_v4  ;;  %272 = vmatpush.msra.mxu1 %v78_v4  ;;  %v66_v18 = vld [vmem:[#allocation2 + $0x10] sm:$0xff]  ;;  %v65_v19 = vld [vmem:[#allocation2 + $0x8] sm:$0xff]  ;;  %v64_v20 = vld [vmem:[#allocation2] sm:$0xff] }
   0xe   :  { %274 = vmatpush.msra.mxu3 %v78_v4  ;;  %82 = vmatpush.msra.mxu0 %v77_v5  ;;  %v154_v32 = vld [vmem:[%s493_s1] sm:$0xff]  ;;  %v155_v33 = vld [vmem:[%s493_s1 + $0x8] sm:$0xff]  ;;  %v156_v34 = vld [vmem:[%s493_s1 + $0x10] sm:$0xff] }
   0xf   :  { %276 = vmatpush.msra.mxu2 %v77_v5  ;;  %275 = vmatpush.msra.mxu1 %v77_v5  ;;  %v157_v35 = vld [vmem:[%s493_s1 + $0x18] sm:$0xff]  ;;  %s416_s1 = smov [#allocation6]  }
  0x10   :  { %277 = vmatpush.msra.mxu3 %v77_v5  ;;  %83 = vmatpush.msra.mxu0 %v76_v6  ;;  %s231_s10 = sshll.u32 %s416_s1, 4  ;;  %s232_s10 = int_to_ptr.vmem [resolvable:$true] %s231_s10 }
  0x11   :  { %279 = vmatpush.msra.mxu2 %v76_v6  ;;  %50 = vperm.xlu0 %326, %v39_v7  }
  0x12   :  { %44 = vperm.xlu1 %327, %v37_v8   ;;  %84 = vmatpush.msra.mxu0 %v75_v9 }
  0x13   :  { %282 = vmatpush.msra.mxu2 %v75_v9  ;;  %278 = vmatpush.msra.mxu1 %v76_v6 }
  0x14   :  { %280 = vmatpush.msra.mxu3 %v76_v6  ;;  %85 = vmatpush.msra.mxu0 %v74_v10 }
  0x15   :  { %285 = vmatpush.msra.mxu2 %v74_v10  ;;  %281 = vmatpush.msra.mxu1 %v75_v9 }
  0x16   :  { %283 = vmatpush.msra.mxu3 %v75_v9  ;;  %86 = vmatpush.msra.mxu0 %v73_v11 }
  0x17   :  { %288 = vmatpush.msra.mxu2 %v73_v11  ;;  %284 = vmatpush.msra.mxu1 %v74_v10 }
  0x18   :  { %286 = vmatpush.msra.mxu3 %v74_v10  ;;  %87 = vmatpush.msra.mxu0 %v72_v12 }
  0x19   :  { %291 = vmatpush.msra.mxu2 %v72_v12  ;;  %287 = vmatpush.msra.mxu1 %v73_v11 }
  0x1a   :  { %289 = vmatpush.msra.mxu3 %v73_v11  ;;  %88 = vmatpush.msra.mxu0 %v71_v13 }
  0x1b   :  { %294 = vmatpush.msra.mxu2 %v71_v13  ;;  %290 = vmatpush.msra.mxu1 %v72_v12 }
  0x1c   :  { %292 = vmatpush.msra.mxu3 %v72_v12  ;;  %89 = vmatpush.msra.mxu0 %v70_v14 }
  0x1d   :  { %297 = vmatpush.msra.mxu2 %v70_v14  ;;  %293 = vmatpush.msra.mxu1 %v71_v13 }
  0x1e   :  { %295 = vmatpush.msra.mxu3 %v71_v13  ;;  %90 = vmatpush.msra.mxu0 %v69_v15 }
  0x1f   :  { %300 = vmatpush.msra.mxu2 %v69_v15  ;;  %296 = vmatpush.msra.mxu1 %v70_v14 }
  0x20   :  { %298 = vmatpush.msra.mxu3 %v70_v14  ;;  %91 = vmatpush.msra.mxu0 %v68_v16 }
  0x21   :  { %303 = vmatpush.msra.mxu2 %v68_v16  ;;  %299 = vmatpush.msra.mxu1 %v69_v15 }
  0x22   :  { %301 = vmatpush.msra.mxu3 %v69_v15  ;;  %92 = vmatpush.msra.mxu0 %v67_v17 }
  0x23   :  { %306 = vmatpush.msra.mxu2 %v67_v17  ;;  %302 = vmatpush.msra.mxu1 %v68_v16 }
  0x24   :  { %304 = vmatpush.msra.mxu3 %v68_v16  ;;  %93 = vmatpush.msra.mxu0 %v66_v18 }
  0x25   :  { %309 = vmatpush.msra.mxu2 %v66_v18  ;;  %305 = vmatpush.msra.mxu1 %v67_v17 }
  0x26   :  { %307 = vmatpush.msra.mxu3 %v67_v17  ;;  %94 = vmatpush.msra.mxu0 %v65_v19 }
  0x27   :  { %312 = vmatpush.msra.mxu2 %v65_v19  ;;  %308 = vmatpush.msra.mxu1 %v66_v18 }
  0x28   :  { %310 = vmatpush.msra.mxu3 %v66_v18  ;;  %95 = vmatpush.msra.mxu0 %v64_v20 }
  0x29   :  { %311 = vmatpush.msra.mxu1 %v65_v19  ;;  %315 = vmatpush.msra.mxu2 %v64_v20 }
  0x2a   :  { %313 = vmatpush.msra.mxu3 %v65_v19 }
  0x2b   :  { %314 = vmatpush.msra.mxu1 %v64_v20 }
  0x2c   :  { %316 = vmatpush.msra.mxu3 %v64_v20 }
  0x7b   :  { %v48_v23 = vpop.permute.xlu0 %47 }
  0x7c   :  { %v42_v24 = vpop.permute.xlu1 %41  ;;  %vm54_vm0 = vcmp.eq.s32.totalorder %v461_v22, %v48_v23 }
  0x7d   :  { %vm52_vm1 = vcmp.eq.s32.totalorder %v461_v22, %v42_v24  ;;  %267 = vmatmul.msk.f32.vlgmr.msra.gmra.mxu2 %vm54_vm0, %v415_v25 }
  0x7e   :  { %265 = vmatmul.msk.f32.vlgmr.msra.gmra.mxu0 %vm52_vm1, %v415_v25 }
  0x83   :  { %v51_v26 = vpop.permute.xlu0 %50 }
  0x84   :  { %v45_v27 = vpop.permute.xlu1 %44  ;;  %vm55_vm2 = vcmp.eq.s32.totalorder %v461_v22, %v51_v26 }
  0x85   :  { %vm53_vm3 = vcmp.eq.s32.totalorder %v461_v22, %v45_v27  ;;  %268 = vmatmul.msk.f32.vlgmr.msra.gmra.mxu3 %vm55_vm2, %v415_v25 }
  0x86   :  { %266 = vmatmul.msk.f32.vlgmr.msra.gmra.mxu1 %vm53_vm3, %v415_v25 }
  0xfb   :  { %v97_v28 = vpop.f32.mrf.mxu0 }
  0xfc   :  { %109 = vst [vmem:[#allocation6] sm:$0xff] %v97_v28  ;;  %114 = vmax.xlane.f32.xlu2 %v97_v28 }
 0x100   :  { %v103_v29 = vpop.f32.mrf.mxu2 }
 0x101   :  { %111 = vst [vmem:[#allocation6 + $0x10] sm:$0xff] %v103_v29  ;;  %118 = vmax.xlane.f32.xlu0 %v103_v29 }
 0x103   :  { %v100_v30 = vpop.f32.mrf.mxu1 }
 0x104   :  { %110 = vst [vmem:[#allocation6 + $0x8] sm:$0xff] %v100_v30  ;;  %116 = vmax.xlane.f32.xlu2 %v100_v30 }
 0x108   :  { %v106_v31 = vpop.f32.mrf.mxu3 }
 0x109   :  { %112 = vst [vmem:[#allocation6 + $0x18] sm:$0xff] %v106_v31  ;;  %120 = vmax.xlane.f32.xlu1 %v106_v31 }
 0x10a   :  { %239 = dma.vmem_to_hbm [thread:$0]  %s232_s10, 512, %s234_s13, [#allocation4], %s412_s20, %s412_s20, %s413_s21  }
 0x11c   :  { %159 = vperm.xlu2 %328, %v154_v32  }
 0x124   :  { %162 = vperm.xlu2 %328, %v155_v33  }
 0x12c   :  { %165 = vperm.xlu2 %328, %v156_v34  }
 0x134   :  { %168 = vperm.xlu2 %328, %v157_v35  }
 0x16f   :  { %v115_v36 = vpop.xlane.xlu2 %114 }
 0x170   :  { %v122_v37 = vsub.f32 %v97_v28, %v115_v36 }
 0x172   :  { %v126_v38 = vmul.f32 1.442695, %v122_v37 }
 0x174   :  { %329 = vpow2.f32 %v126_v38  ;;  %v119_v39 = vpop.xlane.xlu0 %118 }
 0x175   :  { %v124_v40 = vsub.f32 %v103_v29, %v119_v39 }
 0x177   :  { %v117_v41 = vpop.xlane.xlu2 %116  ;;  %v130_v42 = vmul.f32 1.442695, %v124_v40 }
 0x178   :  { %v123_v43 = vsub.f32 %v100_v30, %v117_v41 }
 0x179   :  { %331 = vpow2.f32 %v130_v42 }
 0x17a   :  { %v330_v44 = vpop.eup %329  ;;  %v128_v45 = vmul.f32 1.442695, %v123_v43 }
 0x17b   :  { %134 = vadd.xlane.f32.xlu0 %v330_v44 }
 0x17c   :  { %333 = vpow2.f32 %v128_v45  ;;  %v121_v46 = vpop.xlane.xlu1 %120 }
 0x17d   :  { %v125_v47 = vsub.f32 %v106_v31, %v121_v46 }
 0x17f   :  { %v160_v48 = vpop.permute.xlu2 %159  ;;  %v332_v49 = vpop.eup %331  ;;  %v132_v50 = vmul.f32 1.442695, %v125_v47 }
 0x180   :  { %138 = vadd.xlane.f32.xlu2 %v332_v49  ;;  %vm170_vm4 = vcmp.eq.s32.totalorder %v461_v22, %v160_v48 }
 0x181   :  { %335 = vpow2.f32 %v132_v50  ;;  %v174_v54 = vsel %vm170_vm4, %v97_v28, 0.0 }
 0x182   :  { %v334_v51 = vpop.eup %333 }
 0x183   :  { %136 = vadd.xlane.f32.xlu1 %v334_v51 }
 0x187   :  { %v163_v52 = vpop.permute.xlu2 %162  ;;  %v336_v53 = vpop.eup %335 }
 0x188   :  { %140 = vadd.xlane.f32.xlu0 %v336_v53  ;;  %vm171_vm5 = vcmp.eq.s32.totalorder %v461_v22, %v163_v52 }
 0x189   :  { %v175_v56 = vsel %vm171_vm5, %v100_v30, 0.0 }
 0x18b   :  { %178 = vadd.xlane.f32.xlu1 %v174_v54 }
 0x18f   :  { %v166_v55 = vpop.permute.xlu2 %165 }
 0x190   :  { %vm172_vm6 = vcmp.eq.s32.totalorder %v461_v22, %v166_v55  ;;  %180 = vadd.xlane.f32.xlu0 %v175_v56 }
 0x191   :  { %v176_v57 = vsel %vm172_vm6, %v103_v29, 0.0 }
 0x193   :  { %182 = vadd.xlane.f32.xlu1 %v176_v57 }
 0x197   :  { %v169_v58 = vpop.permute.xlu2 %168 }
 0x198   :  { %vm173_vm7 = vcmp.eq.s32.totalorder %v461_v22, %v169_v58 }
 0x199   :  { %v177_v59 = vsel %vm173_vm7, %v106_v31, 0.0 }
 0x19a   :  { %184 = vadd.xlane.f32.xlu0 %v177_v59 }
 0x1ee   :  { %v135_v60 = vpop.xlane.xlu0 %134 }
 0x1ef   :  { %337 = vlog2.f32 %v135_v60 }
 0x1f3   :  { %v139_v61 = vpop.xlane.xlu2 %138 }
 0x1f5   :  { %v338_v63 = vpop.eup %337 }
 0x1f6   :  { %v137_v62 = vpop.xlane.xlu1 %136  ;;  %v143_v5 = vmul.f32 0.6931472, %v338_v63 }
 0x1f7   :  { %339 = vlog2.f32 %v137_v62 }
 0x1f8   :  { %341 = vlog2.f32 %v139_v61  ;;  %v150_v8 = vadd.f32 %v143_v5, %v115_v36 }
 0x1fb   :  { %v141_v0 = vpop.xlane.xlu0 %140 }
 0x1fc   :  { %343 = vlog2.f32 %v141_v0 }
 0x1fd   :  { %v340_v1 = vpop.eup %339 }
 0x1fe   :  { %v179_v2 = vpop.xlane.xlu1 %178  ;;  %v342_v3 = vpop.eup %341  ;;  %v145_v4 = vmul.f32 0.6931472, %v340_v1 }
 0x1ff   :  { %v147_v6 = vmul.f32 0.6931472, %v342_v3  ;;  %v186_v12 = vsub.f32 %v150_v8, %v179_v2 }
 0x200   :  { %v151_v7 = vadd.f32 %v145_v4, %v117_v41 }
 0x201   :  { %v152_v13 = vadd.f32 %v147_v6, %v119_v39  ;;  %v209_v18 = vsel %vm208_vm8, %v186_v12, 0.0 }
 0x202   :  { %v344_v10 = vpop.eup %343 }
 0x203   :  { %v181_v9 = vpop.xlane.xlu0 %180  ;;  %v149_v15 = vmul.f32 0.6931472, %v344_v10 }
 0x204   :  { %v187_v11 = vsub.f32 %v151_v7, %v181_v9 }
 0x205   :  { %v153_v21 = vadd.f32 %v149_v15, %v121_v46 }
 0x206   :  { %v183_v14 = vpop.xlane.xlu1 %182  ;;  %v210_v16 = vsel %vm208_vm8, %v187_v11, 0.0 }
 0x207   :  { %v188_v17 = vsub.f32 %v152_v13, %v183_v14  ;;  %v211_v19 = vadd.f32 %v210_v16, %v209_v18 }
 0x209   :  { %v212_v20 = vsel %vm208_vm8, %v188_v17, 0.0 }
 0x20a   :  { %v213_v24 = vadd.f32 %v212_v20, %v211_v19 }
 0x20d   :  { %v185_v22 = vpop.xlane.xlu0 %184 }
 0x20e   :  { %v189_v23 = vsub.f32 %v153_v21, %v185_v22 }
 0x210   :  { %v214_v25 = vsel %vm208_vm8, %v189_v23, 0.0 }
 0x211   :  { %v215_v26 = vadd.f32 %v214_v25, %v213_v24 }
 0x213   :  { %216 = vadd.xlane.f32.xlu1 %v215_v26 }
 0x286   :  { %v217_v27 = vpop.xlane.xlu1 %216 }
 0x287   :  { %v218_v28 = vrot.slane %v217_v27, 4 }
 0x289   :  { %v219_v29 = vadd.f32 %v218_v28, %v217_v27 }
 0x28b   :  { %v220_v30 = vrot.slane %v219_v29, 2 }
 0x28d   :  { %v221_v31 = vadd.f32 %v220_v30, %v219_v29 }
 0x28f   :  { %v222_v32 = vrot.slane %v221_v31, 1 }
 0x291   :  { %v223_v33 = vadd.f32 %v222_v32, %v221_v31 }
 0x293   :  { %317 = vpush %v223_v33 }
 0x2c4   :  { %s318_s3 = spop %317 }
 0x2c5   :  { %226 = sst [smem:[#allocation7]] %s318_s3 }
 0x2c6   :  { %248 = dma.smem_to_hbm %s417_s17, 16, %s246_s16, [#allocation5]  }
 0x2c7   :  { %407 = dma.done.wait [#allocation4], 512  }
 0x2c8   :  { %408 = vsyncadd [#allocation4], 4294966784 }
 0x2c9   :  { %409 = dma.done.wait [#allocation5], 16  }
 0x2ca   :  { %410 = vsyncadd [#allocation5], 4294967280 }
 0x2cb   :  { %257 = sfence }
 0x2cc   :  { %258 = vsyncpa [#allocation3], 1 }
 0x2cd   :  { %259 = vsyncpa [#allocation4], 1 }
 0x2ce   :  { %260 = vsyncpa [#allocation5], 1 }

</bundles_post_ra>
